<compile_context>
chip_gen: v7x
topology: tpu7x:2x2x1
jax: 0.10.0
libtpu: 0.0.40
codegen_flags: <defaults>
</compile_context>

<pallas_src>
import jax
import jax.numpy as jnp
from jax.experimental import pallas as pl
from jax.experimental.pallas import tpu as pltpu

LN_EPS = 1e-5  # PyTorch nn.LayerNorm default


def _round_up(v, m):
    return ((v + m - 1) // m) * m


def _distance_head_kernel(x_ref, w1_ref, b1_ref, g_ref, be_ref, w2_ref, b2_ref,
                          o_ref):
    # x_ref: (TM, H) tile of flattened pair features.
    x = x_ref[...].astype(jnp.float32)

    # dense: y = x @ W1 + b1   (W1 stored (in, out) so no transpose needed)
    h = jnp.dot(x, w1_ref[...].astype(jnp.float32),
                preferred_element_type=jnp.float32)
    h = h + b1_ref[...].astype(jnp.float32)

    # exact GELU (matches torch.nn.functional.gelu default)
    inv_sqrt2 = jnp.float32(0.7071067811865476)
    h = 0.5 * h * (1.0 + jax.lax.erf(h * inv_sqrt2))

    # LayerNorm over the heads dim
    mean = jnp.mean(h, axis=-1, keepdims=True)
    centered = h - mean
    var = jnp.mean(centered * centered, axis=-1, keepdims=True)
    hn = centered * jax.lax.rsqrt(var + jnp.float32(LN_EPS))
    hn = hn * g_ref[...].astype(jnp.float32) + be_ref[...].astype(jnp.float32)

    # out_proj as VPU multiply + XLU lane-reduce (avoids a 1-wide MXU matmul).
    # Reshape (TM, H) -> (TM//128, 128, H): pure leading-dim split (last dim
    # unchanged), so the result of the reduce is already lane-dense.
    tm, hdim = hn.shape
    hn3 = hn.reshape(tm // 128, 128, hdim)
    w2 = w2_ref[...].astype(jnp.float32).reshape(1, 1, hdim)
    out = jnp.sum(hn3 * w2, axis=-1) + b2_ref[0, 0]        # (TM//128, 128)
    o_ref[...] = out.astype(o_ref.dtype)


def distance_head_pallas(x, params, *, tile_rows=4096,
                         vmem_limit_bytes=32 * 1024 * 1024):
    """x: (bsz, seq, seq, heads) float32/bfloat16 -> (bsz, seq, seq) float32."""
    bsz, s1, s2, heads = x.shape
    assert s1 == s2
    n = bsz * s1 * s2
    x_flat = x.reshape(n, heads)

    # Tile-size selection.  Lane-dense output needs tm % 128 == 0; when the
    # grid has more than one step the output block's sublane dim (tm//128)
    # must itself be a multiple of 8, i.e. tm % 1024 == 0.
    if n <= tile_rows:
        tm = _round_up(max(n, 128), 128)
        n_blocks = 1
    else:
        tm = max(1024, (tile_rows // 1024) * 1024)
        n_blocks = -(-n // tm)            # cdiv; last block may be partial
    rows_out = (n_blocks * tm) // 128

    w1, b1, gamma, beta, w2, b2 = (
        params["w1"], params["b1"], params["gamma"], params["beta"],
        params["w2"], params["b2"],
    )

    out2d = pl.pallas_call(
        _distance_head_kernel,
        out_shape=jax.ShapeDtypeStruct((rows_out, 128), jnp.float32),
        grid_spec=pltpu.PrefetchScalarGridSpec(
            num_scalar_prefetch=0,
            grid=(n_blocks,),
            in_specs=[
                pl.BlockSpec((tm, heads), lambda i: (i, 0)),       # x tile
                pl.BlockSpec((heads, heads), lambda i: (0, 0)),    # W1 (in,out)
                pl.BlockSpec((1, heads), lambda i: (0, 0)),        # b1
                pl.BlockSpec((1, heads), lambda i: (0, 0)),        # LN gamma
                pl.BlockSpec((1, heads), lambda i: (0, 0)),        # LN beta
                pl.BlockSpec((1, heads), lambda i: (0, 0)),        # W2 row
                pl.BlockSpec(memory_space=pltpu.MemorySpace.SMEM), # b2 scalar
            ],
            out_specs=pl.BlockSpec((tm // 128, 128), lambda i: (i, 0)),
        ),
        compiler_params=pltpu.CompilerParams(
            dimension_semantics=("parallel",),
            vmem_limit_bytes=vmem_limit_bytes),
    )(x_flat, w1, b1, gamma, beta, w2, b2)

    out = out2d.reshape(-1)[:n].reshape(bsz, s1, s2)
    # symmetrize: (x + x.T) * 0.5 over the two seq axes (plain-JAX glue)
    out = (out + jnp.swapaxes(out, -1, -2)) * 0.5
    return out


def init_params(key, heads):
    """Deterministic synthetic params.  Linear weights stored as (in, out)
    so the kernel computes x @ W + b (equivalent to torch's x @ W.T + b).
    out_proj weight is stored as a (1, heads) row for the VPU+XLU reduce."""
    k1, k2, k3, k4 = jax.random.split(key, 4)
    scale = 1.0 / jnp.sqrt(heads)
    return {
        "w1": jax.random.uniform(k1, (heads, heads), jnp.float32, -scale, scale),
        "b1": jax.random.uniform(k2, (1, heads), jnp.float32, -scale, scale),
        "gamma": jnp.ones((1, heads), jnp.float32),
        "beta": jnp.zeros((1, heads), jnp.float32),
        "w2": jax.random.uniform(k3, (1, heads), jnp.float32, -scale, scale),
        "b2": jax.random.uniform(k4, (1, 1), jnp.float32, -scale, scale),
    }


def distance_head_ref(x, params):
    """Pure-JAX reference mirroring the PyTorch forward."""
    h = jnp.einsum("bijh,hk->bijk", x.astype(jnp.float32), params["w1"])
    h = h + params["b1"][0]
    h = 0.5 * h * (1.0 + jax.lax.erf(h / jnp.sqrt(2.0)))
    mean = jnp.mean(h, axis=-1, keepdims=True)
    var = jnp.mean((h - mean) ** 2, axis=-1, keepdims=True)
    h = (h - mean) / jnp.sqrt(var + LN_EPS)
    h = h * params["gamma"][0] + params["beta"][0]
    o = jnp.einsum("bijh,h->bij", h, params["w2"][0]) + params["b2"][0, 0]
    return (o + jnp.swapaxes(o, -1, -2)) * 0.5


if __name__ == "__main__":
    key = jax.random.PRNGKey(0)
    kx1, kx2, kx3, kp = jax.random.split(key, 4)

    heads = 32
    params = init_params(kp, heads)

    # 1) primary small check (bsz=2, seq=8): single block, exact tiling
    x = jax.random.normal(kx1, (2, 8, 8, heads), jnp.float32)
    out = jax.block_until_ready(distance_head_pallas(x, params))
    ref = distance_head_ref(x, params)
    assert out.shape == (2, 8, 8)
    assert jnp.allclose(out, ref, atol=1e-4, rtol=1e-4), (
        float(jnp.max(jnp.abs(out - ref))))

    # 2) multi-block check: exercises the >1-step grid and the lane-dense
    #    (TM//128, 128) output path (tm=1024, 2 grid steps).
    x2 = jax.random.normal(kx2, (2, 32, 32, heads), jnp.float32)
    out2 = jax.block_until_ready(distance_head_pallas(x2, params, tile_rows=1024))
    ref2 = distance_head_ref(x2, params)
    assert jnp.allclose(out2, ref2, atol=1e-4, rtol=1e-4), (
        float(jnp.max(jnp.abs(out2 - ref2))))

    # 3) ragged check: n = 1*6*6 = 36 rows does not fill the 128-row tile;
    #    relies on Pallas partial-boundary-block handling (no jnp.pad copy).
    x3 = jax.random.normal(kx3, (1, 6, 6, heads), jnp.float32)
    out3 = jax.block_until_ready(distance_head_pallas(x3, params))
    ref3 = distance_head_ref(x3, params)
    assert jnp.allclose(out3, ref3, atol=1e-4, rtol=1e-4), (
        float(jnp.max(jnp.abs(out3 - ref3))))

    print("KERNEL_OK")
</pallas_src>

<mosaic_0001>
module attributes {stable_mosaic.version = 11 : i64} {
  func.func @_distance_head_kernel(%arg0: i32, %arg1: memref<128x32xf32, #tpu.memory_space<vmem>>, %arg2: memref<32x32xf32, #tpu.memory_space<vmem>>, %arg3: memref<1x32xf32, #tpu.memory_space<vmem>>, %arg4: memref<1x32xf32, #tpu.memory_space<vmem>>, %arg5: memref<1x32xf32, #tpu.memory_space<vmem>>, %arg6: memref<1x32xf32, #tpu.memory_space<vmem>>, %arg7: memref<1x1xf32, #tpu.memory_space<smem>>, %arg8: memref<1x128xf32, #tpu.memory_space<vmem>>) attributes {dimension_semantics = [#tpu.dimension_semantics<parallel>], iteration_bounds = array<i64: 1>, scalar_prefetch = 0 : i64, scratch_operands = 0 : i64, tpu.core_type = #tpu.core_type<tc>, window_params = [{transform_indices = @transform_0, window_bounds = array<i64: 128, 32>}, {pipeline_mode = #tpu.pipeline_mode<synchronous>, transform_indices = @transform_1, window_bounds = array<i64: 32, 32>}, {pipeline_mode = #tpu.pipeline_mode<synchronous>, transform_indices = @transform_2, window_bounds = array<i64: 1, 32>}, {pipeline_mode = #tpu.pipeline_mode<synchronous>, transform_indices = @transform_3, window_bounds = array<i64: 1, 32>}, {pipeline_mode = #tpu.pipeline_mode<synchronous>, transform_indices = @transform_4, window_bounds = array<i64: 1, 32>}, {pipeline_mode = #tpu.pipeline_mode<synchronous>, transform_indices = @transform_5, window_bounds = array<i64: 1, 32>}, {transform_indices = @transform_6, window_bounds = array<i64: 1, 1>}, {transform_indices = @transform_7, window_bounds = array<i64: 1, 128>}]} {
    %c0 = arith.constant 0 : index
    %c0_0 = arith.constant 0 : index
    %0 = vector.load %arg1[%c0, %c0_0] : memref<128x32xf32, #tpu.memory_space<vmem>>, vector<128x32xf32>
    %c0_1 = arith.constant 0 : index
    %c0_2 = arith.constant 0 : index
    %1 = vector.load %arg2[%c0_1, %c0_2] : memref<32x32xf32, #tpu.memory_space<vmem>>, vector<32x32xf32>
    %cst = arith.constant dense<0.000000e+00> : vector<128x32xf32>
    %2 = tpu.matmul %0, %1, %cst {dimension_numbers = #tpu.dot_dimension_numbers<[1], [0], [0], [1], [0, 0, 1, 1], [], []>} : vector<128x32xf32>, vector<32x32xf32>, vector<128x32xf32> -> vector<128x32xf32>
    %c0_3 = arith.constant 0 : index
    %c0_4 = arith.constant 0 : index
    %3 = vector.load %arg3[%c0_3, %c0_4] : memref<1x32xf32, #tpu.memory_space<vmem>>, vector<1x32xf32>
    %4 = vector.broadcast %3 : vector<1x32xf32> to vector<128x32xf32>
    %5 = arith.addf %2, %4 : vector<128x32xf32>
    %cst_5 = arith.constant 5.000000e-01 : f32
    %6 = vector.broadcast %cst_5 : f32 to vector<128x32xf32>
    %7 = arith.mulf %6, %5 : vector<128x32xf32>
    %cst_6 = arith.constant 0.707106769 : f32
    %8 = vector.broadcast %cst_6 : f32 to vector<128x32xf32>
    %9 = arith.mulf %5, %8 : vector<128x32xf32>
    %10 = math.erf %9 : vector<128x32xf32>
    %cst_7 = arith.constant 1.000000e+00 : f32
    %11 = vector.broadcast %cst_7 : f32 to vector<128x32xf32>
    %12 = arith.addf %11, %10 : vector<128x32xf32>
    %13 = arith.mulf %7, %12 : vector<128x32xf32>
    %cst_8 = arith.constant dense<0.000000e+00> : vector<128xf32>
    %14 = vector.multi_reduction <add>, %13, %cst_8 [1] : vector<128x32xf32> to vector<128xf32>
    %15 = vector.shape_cast %14 : vector<128xf32> to vector<128x1xf32>
    %cst_9 = arith.constant 3.200000e+01 : f32
    %16 = vector.broadcast %cst_9 : f32 to vector<128x1xf32>
    %17 = arith.divf %15, %16 : vector<128x1xf32>
    %18 = vector.broadcast %17 : vector<128x1xf32> to vector<128x32xf32>
    %19 = arith.subf %13, %18 : vector<128x32xf32>
    %20 = arith.mulf %19, %19 : vector<128x32xf32>
    %cst_10 = arith.constant dense<0.000000e+00> : vector<128xf32>
    %21 = vector.multi_reduction <add>, %20, %cst_10 [1] : vector<128x32xf32> to vector<128xf32>
    %22 = vector.shape_cast %21 : vector<128xf32> to vector<128x1xf32>
    %cst_11 = arith.constant 3.200000e+01 : f32
    %23 = vector.broadcast %cst_11 : f32 to vector<128x1xf32>
    %24 = arith.divf %22, %23 : vector<128x1xf32>
    %cst_12 = arith.constant 9.99999974E-6 : f32
    %25 = vector.broadcast %cst_12 : f32 to vector<128x1xf32>
    %26 = arith.addf %24, %25 : vector<128x1xf32>
    %27 = math.rsqrt %26 : vector<128x1xf32>
    %28 = vector.broadcast %27 : vector<128x1xf32> to vector<128x32xf32>
    %29 = arith.mulf %19, %28 : vector<128x32xf32>
    %c0_13 = arith.constant 0 : index
    %c0_14 = arith.constant 0 : index
    %30 = vector.load %arg4[%c0_13, %c0_14] : memref<1x32xf32, #tpu.memory_space<vmem>>, vector<1x32xf32>
    %31 = vector.broadcast %30 : vector<1x32xf32> to vector<128x32xf32>
    %32 = arith.mulf %29, %31 : vector<128x32xf32>
    %c0_15 = arith.constant 0 : index
    %c0_16 = arith.constant 0 : index
    %33 = vector.load %arg5[%c0_15, %c0_16] : memref<1x32xf32, #tpu.memory_space<vmem>>, vector<1x32xf32>
    %34 = vector.broadcast %33 : vector<1x32xf32> to vector<128x32xf32>
    %35 = arith.addf %32, %34 : vector<128x32xf32>
    %36 = vector.shape_cast %35 : vector<128x32xf32> to vector<1x128x32xf32>
    %c0_17 = arith.constant 0 : index
    %c0_18 = arith.constant 0 : index
    %37 = vector.load %arg6[%c0_17, %c0_18] : memref<1x32xf32, #tpu.memory_space<vmem>>, vector<1x32xf32>
    %38 = vector.shape_cast %37 : vector<1x32xf32> to vector<1x1x32xf32>
    %39 = vector.broadcast %38 : vector<1x1x32xf32> to vector<1x128x32xf32>
    %40 = arith.mulf %36, %39 : vector<1x128x32xf32>
    %cst_19 = arith.constant dense<0.000000e+00> : vector<1x128xf32>
    %41 = vector.multi_reduction <add>, %40, %cst_19 [2] : vector<1x128x32xf32> to vector<1x128xf32>
    %c0_20 = arith.constant 0 : index
    %c0_21 = arith.constant 0 : index
    %42 = memref.load %arg7[%c0_20, %c0_21] : memref<1x1xf32, #tpu.memory_space<smem>>
    %43 = vector.broadcast %42 : f32 to vector<1x128xf32>
    %44 = arith.addf %41, %43 : vector<1x128xf32>
    %c0_22 = arith.constant 0 : index
    %c0_23 = arith.constant 0 : index
    %45 = vector.load %arg8[%c0_22, %c0_23] : memref<1x128xf32, #tpu.memory_space<vmem>>, vector<1x128xf32>
    tpu.vector_store %arg8[%c0_22, %c0_23], %44 {strides = array<i32>} : memref<1x128xf32, #tpu.memory_space<vmem>>, vector<1x128xf32>,
    return
  }
  func.func @transform_0(%arg0: i32) -> (i32, i32) {
    %c0_i32 = arith.constant 0 : i32
    %c0_i32_0 = arith.constant 0 : i32
    return %arg0, %c0_i32 : i32, i32
  }
  func.func @transform_1(%arg0: i32) -> (i32, i32) {
    %c0_i32 = arith.constant 0 : i32
    %c0_i32_0 = arith.constant 0 : i32
    %c0_i32_1 = arith.constant 0 : i32
    return %c0_i32, %c0_i32_0 : i32, i32
  }
  func.func @transform_2(%arg0: i32) -> (i32, i32) {
    %c0_i32 = arith.constant 0 : i32
    %c0_i32_0 = arith.constant 0 : i32
    %c0_i32_1 = arith.constant 0 : i32
    return %c0_i32, %c0_i32_0 : i32, i32
  }
  func.func @transform_3(%arg0: i32) -> (i32, i32) {
    %c0_i32 = arith.constant 0 : i32
    %c0_i32_0 = arith.constant 0 : i32
    %c0_i32_1 = arith.constant 0 : i32
    return %c0_i32, %c0_i32_0 : i32, i32
  }
  func.func @transform_4(%arg0: i32) -> (i32, i32) {
    %c0_i32 = arith.constant 0 : i32
    %c0_i32_0 = arith.constant 0 : i32
    %c0_i32_1 = arith.constant 0 : i32
    return %c0_i32, %c0_i32_0 : i32, i32
  }
  func.func @transform_5(%arg0: i32) -> (i32, i32) {
    %c0_i32 = arith.constant 0 : i32
    %c0_i32_0 = arith.constant 0 : i32
    %c0_i32_1 = arith.constant 0 : i32
    return %c0_i32, %c0_i32_0 : i32, i32
  }
  func.func @transform_6(%arg0: i32) -> (i32, i32) {
    %c0_i32 = arith.constant 0 : i32
    %c0_i32_0 = arith.constant 0 : i32
    %c0_i32_1 = arith.constant 0 : i32
    return %c0_i32, %c0_i32_0 : i32, i32
  }
  func.func @transform_7(%arg0: i32) -> (i32, i32) {
    %c0_i32 = arith.constant 0 : i32
    %c0_i32_0 = arith.constant 0 : i32
    return %arg0, %c0_i32 : i32, i32
  }
}

</mosaic_0001>

<bundles_post_ra>
// kernel: tpu_custom_call.1
= control target key start
LH: loop header
LB: loop body
LE: loop exit
PB: predicated region body
PF: predicated region fallthrough
CT: control target
= control target key end

     0   :  { %vm55_vm0 = vcmask 261120   ;;  %s1518_s0 = inlined_call_operand.vmem [shape: f32[128,32], index: 0, kind: input, shape index: {}]   ;;  %s1519_s1 = inlined_call_operand.vmem [shape: f32[32,32], index: 1, kind: input, shape index: {}]   ;;  %s1520_s2 = inlined_call_operand.vmem [shape: f32[1,32], index: 2, kind: input, shape index: {}]   ;;  %s1521_s3 = inlined_call_operand.vmem [shape: f32[1,32], index: 3, kind: input, shape index: {}]   ;;  %s1522_s4 = inlined_call_operand.vmem [shape: f32[1,32], index: 4, kind: input, shape index: {}]   ;;  %s1523_s5 = inlined_call_operand.vmem [shape: f32[1,32], index: 5, kind: input, shape index: {}]   ;;  %s1524_s6 = inlined_call_operand.<no memory space> [shape: f32[1,1], index: 6, kind: input, shape index: {}]   ;;  %s1525_s7 = inlined_call_operand.hbm [shape: f32[1,128], index: 7, kind: output, shape index: {}]  }
   0x1   :  { %v44_v0 = vld [vmem:[%s1519_s1] sm:$0xff]  ;;  %v45_v1 = vld [vmem:[%s1519_s1 + $0x8] sm:$0xff]  ;;  %v46_v2 = vld [vmem:[%s1519_s1 + $0x10] sm:$0xff] }
   0x2   :  { %v888_v3 = vpack.c.bf16 %v45_v1, %v44_v0  ;;  %v47_v4 = vld [vmem:[%s1519_s1 + $0x18] sm:$0xff]  ;;  %v28_v5 = vld [vmem:[%s1518_s0] sm:$0xff] }
   0x3   :  { %v36_v6 = vld [vmem:[%s1518_s0 + $0x40] sm:$0xff]  ;;  %v892_v7 = vpack.c.bf16 %v47_v4, %v46_v2  ;;  %864 = vmatprep.mubr.msk.f32.mxu0 %vm55_vm0, %v28_v5 }
   0x4   :  { %876 = vmatprep.mubr.msk.f32.mxu1 %vm55_vm0, %v36_v6  ;;  %889 = vmatprep.subr.bf16.mxu0 %v888_v3 }
   0x5   :  { %896 = vmatprep.subr.bf16.mxu1 %v888_v3  ;;  %891 = vmatpush3.bf16.msra.mxu0 %v888_v3 }
   0x6   :  { %898 = vmatpush3.bf16.msra.mxu1 %v888_v3  ;;  %893 = vmatprep.subr.bf16.mxu0 %v892_v7 }
   0x7   :  { %897 = vmatprep.subr.bf16.mxu1 %v892_v7 }
   0x8   :  { %13 = vsyncpa [#allocation4], 0  ;;  %v29_v8 = vld [vmem:[%s1518_s0 + $0x8] sm:$0xff]  ;;  %v30_v10 = vld [vmem:[%s1518_s0 + $0x10] sm:$0xff]  ;;  %vm700_vm1 = vcmask 130112   ;;  %vm707_vm2 = vcmask 195712  }
   0x9   :  { %895 = vmatpush3.bf16.msra.mxu0 %v892_v7  ;;  %v37_v9 = vld [vmem:[%s1518_s0 + $0x48] sm:$0xff]  ;;  %v38_v11 = vld [vmem:[%s1518_s0 + $0x50] sm:$0xff]  ;;  %v31_v12 = vld [vmem:[%s1518_s0 + $0x18] sm:$0xff]  ;;  %vm714_vm3 = vcmask 261312   ;;  %vm721_vm4 = vcmask 326912   ;;  %vm728_vm5 = vcmask 392512  }
   0xa   :  { %899 = vmatpush3.bf16.msra.mxu1 %v892_v7  ;;  %v39_v13 = vld [vmem:[%s1518_s0 + $0x58] sm:$0xff]  ;;  %v32_v14 = vld [vmem:[%s1518_s0 + $0x20] sm:$0xff]  ;;  %v33_v16 = vld [vmem:[%s1518_s0 + $0x28] sm:$0xff]  ;;  %vm735_vm6 = vcmask 458112   ;;  %vm742_vm7 = vcmask 523712   ;;  %vm749_vm8 = vcmask 589312  }
   0xb   :  { %v40_v15 = vld [vmem:[%s1518_s0 + $0x60] sm:$0xff]  ;;  %v41_v17 = vld [vmem:[%s1518_s0 + $0x68] sm:$0xff]  ;;  %v34_v18 = vld [vmem:[%s1518_s0 + $0x30] sm:$0xff]  ;;  %vm756_vm9 = vcmask 654912   ;;  %vm763_vm10 = vcmask 720512   ;;  %vm770_vm11 = vcmask 786112  }
   0xc   :  { %865 = vmatmul.mubr.msk.f32.vlgmr.msra.gmra.mrb[0].mxu0 %vm55_vm0, %v29_v8  ;;  %v42_v19 = vld [vmem:[%s1518_s0 + $0x70] sm:$0xff]  ;;  %v35_v20 = vld [vmem:[%s1518_s0 + $0x38] sm:$0xff]  ;;  %v1109_v22 = vld [vmem:[%s1520_s2] ss:$0 sm:$0xff]  ;;  %vm777_vm12 = vcmask 851712   ;;  %vm784_vm13 = vcmask 917312  }
   0xd   :  { %877 = vmatmul.mubr.msk.f32.vlgmr.msra.gmra.mrb[0].mxu1 %vm55_vm0, %v37_v9  ;;  %867 = vmatprep.mubr.msk.f32.mxu0 %vm55_vm0, %v30_v10  ;;  %v43_v21 = vld [vmem:[%s1518_s0 + $0x78] sm:$0xff]  ;;  %vm791_vm14 = vcmask 982912   ;;  %vm798_vm15 = vcmask 1048512  }
   0xe   :  { %879 = vmatprep.mubr.msk.f32.mxu1 %vm55_vm0, %v38_v11 }
  0x10   :  { %868 = vmatmul.mubr.msk.f32.gmra.mrb[2].mxu0 %vm55_vm0, %v31_v12 }
  0x11   :  { %880 = vmatmul.mubr.msk.f32.gmra.mrb[2].mxu1 %vm55_vm0, %v39_v13  ;;  %870 = vmatprep.mubr.msk.f32.mxu0 %vm55_vm0, %v32_v14 }
  0x12   :  { %882 = vmatprep.mubr.msk.f32.mxu1 %vm55_vm0, %v40_v15 }
  0x14   :  { %871 = vmatmul.mubr.msk.f32.gmra.mrb[4].mxu0 %vm55_vm0, %v33_v16 }
  0x15   :  { %883 = vmatmul.mubr.msk.f32.gmra.mrb[4].mxu1 %vm55_vm0, %v41_v17  ;;  %873 = vmatprep.mubr.msk.f32.mxu0 %vm55_vm0, %v34_v18 }
  0x16   :  { %885 = vmatprep.mubr.msk.f32.mxu1 %vm55_vm0, %v42_v19 }
  0x18   :  { %874 = vmatmul.mubr.msk.f32.gmra.mrb[6].mxu0 %vm55_vm0, %v35_v20 }
  0x19   :  { %886 = vmatmul.mubr.msk.f32.gmra.mrb[6].mxu1 %vm55_vm0, %v43_v21 }
  0xdf   :  { %v866_v23 = vpop.f32.mrb[0].mxu0 }
  0xe0   :  { %v878_v24 = vpop.f32.mrb[0].mxu1  ;;  %v176_v25 = vadd.f32 %v866_v23, %v1109_v22  ;;  %v170_v27 = vpop.f32.mrb[1].mxu0 }
  0xe1   :  { %v216_v26 = vadd.f32 %v878_v24, %v1109_v22  ;;  %v210_v28 = vpop.f32.mrb[1].mxu1  ;;  %v171_v29 = vadd.f32 %v1109_v22, %v170_v27 }
  0xe2   :  { %v1115_v30 = vadd.f32 %v1109_v22, %v210_v28  ;;  %v266_v31 = vmul.f32 0.70710677, %v176_v25  ;;  %v250_v7 = vmul.f32 0.5, %v176_v25 }
  0xe3   :  { %v274_v32 = vmul.f32 0.70710677, %v216_v26  ;;  %v265_v33 = vmul.f32 0.70710677, %v171_v29  ;;  %v869_v35 = vpop.f32.mrb[2].mxu0  ;;  %v258_v0 = vmul.f32 0.5, %v216_v26 }
  0xe4   :  { %901 = verf.f32 %v266_v31  ;;  %v273_v34 = vmul.f32 0.70710677, %v1115_v30  ;;  %v881_v36 = vpop.f32.mrb[2].mxu1  ;;  %v186_v37 = vadd.f32 %v869_v35, %v1109_v22  ;;  %v180_v39 = vpop.f32.mrb[3].mxu0  ;;  %v249_v10 = vmul.f32 0.5, %v171_v29 }
  0xe5   :  { %903 = verf.f32 %v274_v32  ;;  %v1120_v38 = vadd.f32 %v881_v36, %v1109_v22  ;;  %v220_v40 = vpop.f32.mrb[3].mxu1  ;;  %v1123_v41 = vadd.f32 %v1109_v22, %v180_v39  ;;  %v257_v31 = vmul.f32 0.5, %v1115_v30 }
  0xe6   :  { %905 = verf.f32 %v265_v33  ;;  %v1126_v42 = vadd.f32 %v1109_v22, %v220_v40  ;;  %v268_v43 = vmul.f32 0.70710677, %v186_v37  ;;  %v252_v11 = vmul.f32 0.5, %v186_v37 }
  0xe7   :  { %v872_v44 = vpop.f32.mrb[4].mxu0  ;;  %907 = verf.f32 %v273_v34  ;;  %v276_v46 = vmul.f32 0.70710677, %v1120_v38  ;;  %v267_v47 = vmul.f32 0.70710677, %v1123_v41  ;;  %v260_v29 = vmul.f32 0.5, %v1120_v38 }
  0xe8   :  { %v884_v45 = vpop.f32.mrb[4].mxu1  ;;  %909 = verf.f32 %v268_v43  ;;  %v275_v48 = vmul.f32 0.70710677, %v1126_v42  ;;  %v1132_v49 = vadd.f32 %v872_v44, %v1109_v22  ;;  %v190_v50 = vpop.f32.mrb[5].mxu0  ;;  %v251_v43 = vmul.f32 0.5, %v1123_v41 }
  0xe9   :  { %v230_v51 = vpop.f32.mrb[5].mxu1  ;;  %911 = verf.f32 %v276_v46  ;;  %v1135_v52 = vadd.f32 %v1109_v22, %v190_v50  ;;  %v1146_v62 = vadd.f32 %v884_v45, %v1109_v22  ;;  %v259_v44 = vmul.f32 0.5, %v1126_v42 }
  0xea   :  { %913 = verf.f32 %v267_v47  ;;  %v270_v53 = vmul.f32 0.70710677, %v1132_v49  ;;  %v1150_v2 = vadd.f32 %v1109_v22, %v230_v51 }
  0xeb   :  { %v875_v54 = vpop.f32.mrb[6].mxu0  ;;  %915 = verf.f32 %v275_v48  ;;  %v269_v56 = vmul.f32 0.70710677, %v1135_v52  ;;  %v278_v12 = vmul.f32 0.70710677, %v1146_v62  ;;  %v253_v42 = vmul.f32 0.5, %v1135_v52 }
  0xec   :  { %v887_v55 = vpop.f32.mrb[6].mxu1  ;;  %v1140_v57 = vadd.f32 %v875_v54, %v1109_v22  ;;  %v200_v58 = vpop.f32.mrb[7].mxu0  ;;  %917 = verf.f32 %v270_v53  ;;  %v277_v15 = vmul.f32 0.70710677, %v1150_v2  ;;  %v254_v54 = vmul.f32 0.5, %v1132_v49 }
  0xed   :  { %v240_v59 = vpop.f32.mrb[7].mxu1  ;;  %v1143_v60 = vadd.f32 %v1109_v22, %v200_v58  ;;  %919 = verf.f32 %v269_v56  ;;  %v1158_v16 = vadd.f32 %v887_v55, %v1109_v22 }
  0xee   :  { %v902_v61 = vpop.eup %901  ;;  %v272_v1 = vmul.f32 0.70710677, %v1140_v57  ;;  %v1163_v19 = vadd.f32 %v1109_v22, %v240_v59  ;;  %v256_v49 = vmul.f32 0.5, %v1140_v57 }
  0xef   :  { %v904_v63 = vpop.eup %903  ;;  %v271_v4 = vmul.f32 0.70710677, %v1143_v60  ;;  %v298_v6 = vadd.f32 1.0, %v902_v61  ;;  %v280_v32 = vmul.f32 0.70710677, %v1158_v16  ;;  %v255_v52 = vmul.f32 0.5, %v1143_v60 }
  0xf0   :  { %v906_v3 = vpop.eup %905  ;;  %v306_v5 = vadd.f32 1.0, %v904_v63  ;;  %921 = verf.f32 %v272_v1  ;;  %v279_v33 = vmul.f32 0.70710677, %v1163_v19  ;;  %v264_v60 = vmul.f32 0.5, %v1158_v16 }
  0xf1   :  { %v297_v8 = vadd.f32 1.0, %v906_v3  ;;  %v908_v9 = vpop.eup %907  ;;  %v1160_v17 = vmul.f32 %v298_v6, %v250_v7  ;;  %923 = verf.f32 %v271_v4  ;;  %v262_v3 = vmul.f32 0.5, %v1146_v62 }
  0xf2   :  { %v1154_v13 = vmul.f32 %v306_v5, %v258_v0  ;;  %v910_v14 = vpop.eup %909  ;;  %v305_v27 = vadd.f32 1.0, %v908_v9  ;;  %925 = verf.f32 %v278_v12 }
  0xf3   :  { %v912_v18 = vpop.eup %911  ;;  %v300_v21 = vadd.f32 1.0, %v910_v14  ;;  %v332_v24 = vsel %vm55_vm0, %v1160_v17, 0.0  ;;  %v1169_v25 = vmul.f32 %v297_v8, %v249_v10  ;;  %927 = verf.f32 %v277_v15 }
  0xf4   :  { %v356_v20 = vsel %vm55_vm0, %v1154_v13, 0.0  ;;  %v914_v23 = vpop.eup %913  ;;  %v308_v26 = vadd.f32 1.0, %v912_v18  ;;  %333 = vadd.xlane.f32.xlu0 %v332_v24  ;;  %v1183_v39 = vmul.f32 %v305_v27, %v257_v31  ;;  %929 = verf.f32 %v280_v32 }
  0xf5   :  { %357 = vadd.xlane.f32.xlu1 %v356_v20  ;;  %v916_v28 = vpop.eup %915  ;;  %v1172_v22 = vmul.f32 %v300_v21, %v252_v11  ;;  %v299_v36 = vadd.f32 1.0, %v914_v23  ;;  %v329_v38 = vsel %vm55_vm0, %v1169_v25, 0.0  ;;  %931 = verf.f32 %v279_v33 }
  0xf6   :  { %v1179_v35 = vmul.f32 %v308_v26, %v260_v29  ;;  %v918_v37 = vpop.eup %917  ;;  %v307_v40 = vadd.f32 1.0, %v916_v28  ;;  %v353_v50 = vsel %vm55_vm0, %v1183_v39, 0.0  ;;  %v261_v8 = vmul.f32 0.5, %v1150_v2 }
  0xf7   :  { %v338_v34 = vsel %vm55_vm0, %v1172_v22, 0.0  ;;  %v920_v30 = vpop.eup %919  ;;  %v1189_v46 = vmul.f32 %v299_v36, %v251_v43  ;;  %v302_v47 = vadd.f32 1.0, %v918_v37  ;;  %v263_v15 = vmul.f32 0.5, %v1163_v19 }
  0xf8   :  { %330 = vadd.xlane.f32.xlu0 %v329_v38  ;;  %v362_v45 = vsel %vm55_vm0, %v1179_v35, 0.0  ;;  %v1193_v51 = vmul.f32 %v307_v40, %v259_v44  ;;  %v301_v53 = vadd.f32 1.0, %v920_v30 }
  0xf9   :  { %339 = vadd.xlane.f32.xlu1 %v338_v34  ;;  %v335_v56 = vsel %vm55_vm0, %v1189_v46, 0.0  ;;  %v1199_v58 = vmul.f32 %v302_v47, %v254_v54 }
  0xfa   :  { %v922_v48 = vpop.eup %921  ;;  %v359_v63 = vsel %vm55_vm0, %v1193_v51, 0.0  ;;  %v1203_v0 = vmul.f32 %v301_v53, %v253_v42 }
  0xfb   :  { %v924_v41 = vpop.eup %923  ;;  %v304_v59 = vadd.f32 1.0, %v922_v48  ;;  %v344_v4 = vsel %vm55_vm0, %v1199_v58, 0.0 }
  0xfc   :  { %354 = vadd.xlane.f32.xlu0 %v353_v50  ;;  %v926_v55 = vpop.eup %925  ;;  %v303_v1 = vadd.f32 1.0, %v924_v41  ;;  %v341_v9 = vsel %vm55_vm0, %v1203_v0, 0.0 }
  0xfd   :  { %363 = vadd.xlane.f32.xlu1 %v362_v45  ;;  %v928_v61 = vpop.eup %927  ;;  %v1210_v5 = vmul.f32 %v304_v59, %v256_v49  ;;  %v310_v6 = vadd.f32 1.0, %v926_v55 }
  0xfe   :  { %v930_v7 = vpop.eup %929  ;;  %v1215_v10 = vmul.f32 %v303_v1, %v255_v52  ;;  %v309_v57 = vadd.f32 1.0, %v928_v61 }
  0xff   :  { %v932_v11 = vpop.eup %931  ;;  %v350_v62 = vsel %vm55_vm0, %v1210_v5, 0.0  ;;  %v1220_v12 = vmul.f32 %v310_v6, %v262_v3  ;;  %v312_v14 = vadd.f32 1.0, %v930_v7 }
 0x100   :  { %360 = vadd.xlane.f32.xlu0 %v359_v63  ;;  %v347_v2 = vsel %vm55_vm0, %v1215_v10, 0.0  ;;  %v1225_v18 = vmul.f32 %v309_v57, %v261_v8  ;;  %v311_v20 = vadd.f32 1.0, %v932_v11 }
 0x101   :  { %336 = vadd.xlane.f32.xlu1 %v335_v56  ;;  %v368_v21 = vsel %vm55_vm0, %v1220_v12, 0.0  ;;  %v1229_v16 = vmul.f32 %v312_v14, %v264_v60 }
 0x102   :  { %v365_v23 = vsel %vm55_vm0, %v1225_v18, 0.0  ;;  %v1233_v24 = vmul.f32 %v311_v20, %v263_v15 }
 0x103   :  { %v374_v19 = vsel %vm55_vm0, %v1229_v16, 0.0 }
 0x104   :  { %342 = vadd.xlane.f32.xlu0 %v341_v9  ;;  %v371_v26 = vsel %vm55_vm0, %v1233_v24, 0.0 }
 0x105   :  { %345 = vadd.xlane.f32.xlu1 %v344_v4 }
 0x108   :  { %348 = vadd.xlane.f32.xlu0 %v347_v2 }
 0x109   :  { %351 = vadd.xlane.f32.xlu1 %v350_v62 }
 0x10c   :  { %366 = vadd.xlane.f32.xlu0 %v365_v23 }
 0x10d   :  { %369 = vadd.xlane.f32.xlu1 %v368_v21 }
 0x110   :  { %372 = vadd.xlane.f32.xlu0 %v371_v26 }
 0x111   :  { %375 = vadd.xlane.f32.xlu1 %v374_v19 }
 0x181   :  { %v334_v29 = vpop.xlane.xlu0 %333 }
 0x182   :  { %v358_v27 = vpop.xlane.xlu1 %357  ;;  %v379_v31 = vmul.f32 0.03125, %v334_v29 }
 0x183   :  { %v387_v28 = vmul.f32 0.03125, %v358_v27 }
 0x184   :  { %v1243_v33 = vsub.f32 %v1160_v17, %v379_v31 }
 0x185   :  { %v1240_v32 = vsub.f32 %v1154_v13, %v387_v28  ;;  %v331_v37 = vpop.xlane.xlu0 %330 }
 0x186   :  { %v340_v34 = vpop.xlane.xlu1 %339  ;;  %v378_v38 = vmul.f32 0.03125, %v331_v37  ;;  %v411_v40 = vmul.f32 %v1243_v33, %v1243_v33 }
 0x187   :  { %v381_v36 = vmul.f32 0.03125, %v340_v34  ;;  %v419_v30 = vmul.f32 %v1240_v32, %v1240_v32 }
 0x188   :  { %v1253_v44 = vsub.f32 %v1169_v25, %v378_v38  ;;  %v429_v17 = vsel %vm55_vm0, %v411_v40, 0.0 }
 0x189   :  { %v1250_v43 = vsub.f32 %v1172_v22, %v381_v36  ;;  %430 = vadd.xlane.f32.xlu1 %v429_v17  ;;  %v355_v47 = vpop.xlane.xlu0 %354  ;;  %v453_v53 = vsel %vm55_vm0, %v419_v30, 0.0 }
 0x18a   :  { %v364_v13 = vpop.xlane.xlu1 %363  ;;  %v386_v48 = vmul.f32 0.03125, %v355_v47  ;;  %v410_v50 = vmul.f32 %v1253_v44, %v1253_v44 }
 0x18b   :  { %v389_v45 = vmul.f32 0.03125, %v364_v13  ;;  %v413_v42 = vmul.f32 %v1250_v43, %v1250_v43 }
 0x18c   :  { %v1263_v22 = vsub.f32 %v1183_v39, %v386_v48  ;;  %v426_v54 = vsel %vm55_vm0, %v410_v50, 0.0 }
 0x18d   :  { %v1260_v41 = vsub.f32 %v1179_v35, %v389_v45  ;;  %454 = vadd.xlane.f32.xlu1 %v453_v53  ;;  %427 = vadd.xlane.f32.xlu0 %v426_v54  ;;  %v361_v56 = vpop.xlane.xlu0 %360  ;;  %v435_v63 = vsel %vm55_vm0, %v413_v42, 0.0 }
 0x18e   :  { %v337_v25 = vpop.xlane.xlu1 %336  ;;  %v388_v59 = vmul.f32 0.03125, %v361_v56  ;;  %v418_v61 = vmul.f32 %v1263_v22, %v1263_v22 }
 0x18f   :  { %v380_v55 = vmul.f32 0.03125, %v337_v25  ;;  %v421_v52 = vmul.f32 %v1260_v41, %v1260_v41 }
 0x190   :  { %v1274_v39 = vsub.f32 %v1193_v51, %v388_v59  ;;  %v450_v49 = vsel %vm55_vm0, %v418_v61, 0.0 }
 0x191   :  { %v1271_v35 = vsub.f32 %v1189_v46, %v380_v55  ;;  %436 = vadd.xlane.f32.xlu1 %v435_v63  ;;  %451 = vadd.xlane.f32.xlu0 %v450_v49  ;;  %v343_v4 = vpop.xlane.xlu0 %342  ;;  %v459_v9 = vsel %vm55_vm0, %v421_v52, 0.0 }
 0x192   :  { %v346_v1 = vpop.xlane.xlu1 %345  ;;  %v382_v46 = vmul.f32 0.03125, %v343_v4  ;;  %v420_v11 = vmul.f32 %v1274_v39, %v1274_v39 }
 0x193   :  { %v383_v3 = vmul.f32 0.03125, %v346_v1  ;;  %v412_v6 = vmul.f32 %v1271_v35, %v1271_v35 }
 0x194   :  { %v1287_v8 = vsub.f32 %v1203_v0, %v382_v46  ;;  %v456_v21 = vsel %vm55_vm0, %v420_v11, 0.0 }
 0x195   :  { %v1283_v7 = vsub.f32 %v1199_v58, %v383_v3  ;;  %v432_v51 = vsel %vm55_vm0, %v412_v6, 0.0  ;;  %460 = vadd.xlane.f32.xlu1 %v459_v9  ;;  %v349_v62 = vpop.xlane.xlu0 %348 }
 0x196   :  { %v352_v57 = vpop.xlane.xlu1 %351  ;;  %433 = vadd.xlane.f32.xlu0 %v432_v51  ;;  %v384_v58 = vmul.f32 0.03125, %v349_v62  ;;  %v414_v23 = vmul.f32 %v1287_v8, %v1287_v8 }
 0x197   :  { %v385_v60 = vmul.f32 0.03125, %v352_v57  ;;  %v415_v14 = vmul.f32 %v1283_v7, %v1283_v7 }
 0x198   :  { %v1299_v2 = vsub.f32 %v1215_v10, %v384_v58  ;;  %v438_v34 = vsel %vm55_vm0, %v414_v23, 0.0 }
 0x199   :  { %v1295_v15 = vsub.f32 %v1210_v5, %v385_v60  ;;  %v441_v0 = vsel %vm55_vm0, %v415_v14, 0.0  ;;  %v367_v26 = vpop.xlane.xlu0 %366  ;;  %v1338_v14 = vld [vmem:[%s1521_s3] ss:$0 sm:$0xff] }
 0x19a   :  { %v370_v20 = vpop.xlane.xlu1 %369  ;;  %442 = vadd.xlane.f32.xlu1 %v441_v0  ;;  %457 = vadd.xlane.f32.xlu0 %v456_v21  ;;  %v390_v5 = vmul.f32 0.03125, %v367_v26  ;;  %v416_v36 = vmul.f32 %v1299_v2, %v1299_v2 }
 0x19b   :  { %v391_v19 = vmul.f32 0.03125, %v370_v20  ;;  %v417_v27 = vmul.f32 %v1295_v15, %v1295_v15 }
 0x19c   :  { %v1311_v29 = vsub.f32 %v1225_v18, %v390_v5  ;;  %v444_v17 = vsel %vm55_vm0, %v416_v36, 0.0 }
 0x19d   :  { %v1307_v28 = vsub.f32 %v1220_v12, %v391_v19  ;;  %v447_v10 = vsel %vm55_vm0, %v417_v27, 0.0  ;;  %v373_v38 = vpop.xlane.xlu0 %372  ;;  %v1344_v19 = vld [vmem:[%s1522_s4] ss:$0 sm:$0xff] }
 0x19e   :  { %v376_v31 = vpop.xlane.xlu1 %375  ;;  %448 = vadd.xlane.f32.xlu1 %v447_v10  ;;  %439 = vadd.xlane.f32.xlu0 %v438_v34  ;;  %v392_v12 = vmul.f32 0.03125, %v373_v38  ;;  %v422_v45 = vmul.f32 %v1311_v29, %v1311_v29 }
 0x19f   :  { %v393_v37 = vmul.f32 0.03125, %v376_v31  ;;  %v423_v40 = vmul.f32 %v1307_v28, %v1307_v28  ;;  %v1350_v31 = vld [vmem:[%s1523_s5] ss:$0 sm:$0xff] }
 0x1a0   :  { %v1323_v13 = vsub.f32 %v1233_v24, %v392_v12 }
 0x1a1   :  { %v1319_v30 = vsub.f32 %v1229_v16, %v393_v37  ;;  %v465_v18 = vsel %vm55_vm0, %v423_v40, 0.0  ;;  %v462_v16 = vsel %vm55_vm0, %v422_v45, 0.0 }
 0x1a2   :  { %466 = vadd.xlane.f32.xlu1 %v465_v18  ;;  %445 = vadd.xlane.f32.xlu0 %v444_v17  ;;  %v424_v50 = vmul.f32 %v1323_v13, %v1323_v13 }
 0x1a3   :  { %v425_v47 = vmul.f32 %v1319_v30, %v1319_v30 }
 0x1a4   :  { %v468_v24 = vsel %vm55_vm0, %v424_v50, 0.0 }
 0x1a5   :  { %v471_v48 = vsel %vm55_vm0, %v425_v47, 0.0 }
 0x1a6   :  { %472 = vadd.xlane.f32.xlu1 %v471_v48  ;;  %463 = vadd.xlane.f32.xlu0 %v462_v16 }
 0x1aa   :  { %469 = vadd.xlane.f32.xlu0 %v468_v24 }
 0x216   :  { %v431_v53 = vpop.xlane.xlu1 %430 }
 0x217   :  { %v475_v25 = vmul.f32 0.03125, %v431_v53 }
 0x219   :  { %v491_v54 = vadd.f32 1e-05, %v475_v25 }
 0x21a   :  { %v455_v42 = vpop.xlane.xlu1 %454  ;;  %v428_v55 = vpop.xlane.xlu0 %427 }
 0x21b   :  { %933 = vrsqrt.f32 %v491_v54  ;;  %v483_v56 = vmul.f32 0.03125, %v455_v42  ;;  %v474_v59 = vmul.f32 0.03125, %v428_v55 }
 0x21d   :  { %v499_v61 = vadd.f32 1e-05, %v483_v56  ;;  %v490_v63 = vadd.f32 1e-05, %v474_v59 }
 0x21e   :  { %v437_v1 = vpop.xlane.xlu1 %436  ;;  %v452_v49 = vpop.xlane.xlu0 %451 }
 0x21f   :  { %935 = vrsqrt.f32 %v499_v61  ;;  %v477_v52 = vmul.f32 0.03125, %v437_v1  ;;  %v482_v3 = vmul.f32 0.03125, %v452_v49 }
 0x220   :  { %937 = vrsqrt.f32 %v490_v63 }
 0x221   :  { %v493_v4 = vadd.f32 1e-05, %v477_v52  ;;  %v498_v6 = vadd.f32 1e-05, %v482_v3 }
 0x222   :  { %v461_v46 = vpop.xlane.xlu1 %460 }
 0x223   :  { %v434_v51 = vpop.xlane.xlu0 %433  ;;  %939 = vrsqrt.f32 %v493_v4  ;;  %v485_v9 = vmul.f32 0.03125, %v461_v46 }
 0x224   :  { %v476_v57 = vmul.f32 0.03125, %v434_v51  ;;  %941 = vrsqrt.f32 %v498_v6 }
 0x225   :  { %v934_v11 = vpop.eup %933  ;;  %v501_v60 = vadd.f32 1e-05, %v485_v9 }
 0x226   :  { %v492_v62 = vadd.f32 1e-05, %v476_v57  ;;  %v523_v20 = vmul.f32 %v934_v11, %v1243_v33 }
 0x227   :  { %v443_v58 = vpop.xlane.xlu1 %442  ;;  %v458_v0 = vpop.xlane.xlu0 %457  ;;  %943 = vrsqrt.f32 %v501_v60 }
 0x228   :  { %v479_v21 = vmul.f32 0.03125, %v443_v58  ;;  %v484_v23 = vmul.f32 0.03125, %v458_v0  ;;  %945 = vrsqrt.f32 %v492_v62  ;;  %v546_v26 = vmul.f32 %v1338_v14, %v523_v20 }
 0x229   :  { %v936_v27 = vpop.eup %935 }
 0x22a   :  { %v495_v5 = vadd.f32 1e-05, %v479_v21  ;;  %v500_v10 = vadd.f32 1e-05, %v484_v23  ;;  %v938_v33 = vpop.eup %937  ;;  %v569_v37 = vadd.f32 %v1344_v19, %v546_v26  ;;  %v531_v38 = vmul.f32 %v936_v27, %v1240_v32 }
 0x22b   :  { %v449_v34 = vpop.xlane.xlu1 %448  ;;  %v440_v36 = vpop.xlane.xlu0 %439  ;;  %v522_v18 = vmul.f32 %v938_v33, %v1253_v44 }
 0x22c   :  { %947 = vrsqrt.f32 %v495_v5  ;;  %v481_v40 = vmul.f32 0.03125, %v449_v34  ;;  %v478_v12 = vmul.f32 0.03125, %v440_v36  ;;  %v592_v17 = vmul.f32 %v1350_v31, %v569_v37 }
 0x22d   :  { %949 = vrsqrt.f32 %v500_v10  ;;  %v554_v45 = vmul.f32 %v1338_v14, %v531_v38  ;;  %v940_v47 = vpop.eup %939  ;;  %v545_v50 = vmul.f32 %v1338_v14, %v522_v18 }
 0x22e   :  { %v497_v48 = vadd.f32 1e-05, %v481_v40  ;;  %v494_v16 = vadd.f32 1e-05, %v478_v12  ;;  %v942_v24 = vpop.eup %941  ;;  %v610_v32 = vsel %vm55_vm0, %v592_v17, 0.0  ;;  %v525_v42 = vmul.f32 %v940_v47, %v1250_v43 }
 0x22f   :  { %v467_v53 = vpop.xlane.xlu1 %466  ;;  %v446_v25 = vpop.xlane.xlu0 %445  ;;  %v577_v54 = vadd.f32 %v1344_v19, %v554_v45  ;;  %611 = vadd.xlane.f32.xlu1 %v610_v32  ;;  %v568_v56 = vadd.f32 %v1344_v19, %v545_v50  ;;  %v530_v63 = vmul.f32 %v942_v24, %v1263_v22 }
 0x230   :  { %951 = vrsqrt.f32 %v497_v48  ;;  %v487_v44 = vmul.f32 0.03125, %v467_v53  ;;  %v480_v55 = vmul.f32 0.03125, %v446_v25  ;;  %v548_v61 = vmul.f32 %v1338_v14, %v525_v42 }
 0x231   :  { %953 = vrsqrt.f32 %v494_v16  ;;  %v600_v59 = vmul.f32 %v1350_v31, %v577_v54  ;;  %v944_v1 = vpop.eup %943  ;;  %v591_v3 = vmul.f32 %v1350_v31, %v568_v56  ;;  %v553_v9 = vmul.f32 %v1338_v14, %v530_v63 }
 0x232   :  { %v503_v49 = vadd.f32 1e-05, %v487_v44  ;;  %v496_v52 = vadd.f32 1e-05, %v480_v55  ;;  %v946_v4 = vpop.eup %945  ;;  %v571_v51 = vadd.f32 %v1344_v19, %v548_v61  ;;  %v533_v57 = vmul.f32 %v944_v1, %v1260_v41 }
 0x233   :  { %v473_v43 = vpop.xlane.xlu1 %472  ;;  %v464_v6 = vpop.xlane.xlu0 %463  ;;  %v634_v46 = vsel %vm55_vm0, %v600_v59, 0.0  ;;  %v607_v22 = vsel %vm55_vm0, %v591_v3, 0.0  ;;  %v576_v58 = vadd.f32 %v1344_v19, %v553_v9  ;;  %v524_v26 = vmul.f32 %v946_v4, %v1271_v35 }
 0x234   :  { %955 = vrsqrt.f32 %v503_v49  ;;  %v489_v11 = vmul.f32 0.03125, %v473_v43  ;;  %v486_v60 = vmul.f32 0.03125, %v464_v6  ;;  %635 = vadd.xlane.f32.xlu1 %v634_v46  ;;  %608 = vadd.xlane.f32.xlu0 %v607_v22  ;;  %v594_v62 = vmul.f32 %v1350_v31, %v571_v51 }
 0x235   :  { %957 = vrsqrt.f32 %v496_v52  ;;  %v556_v0 = vmul.f32 %v1338_v14, %v533_v57  ;;  %v599_v10 = vmul.f32 %v1350_v31, %v576_v58  ;;  %v547_v37 = vmul.f32 %v1338_v14, %v524_v26 }
 0x236   :  { %v948_v20 = vpop.eup %947  ;;  %v505_v21 = vadd.f32 1e-05, %v489_v11  ;;  %v502_v23 = vadd.f32 1e-05, %v486_v60  ;;  %v616_v5 = vsel %vm55_vm0, %v594_v62, 0.0 }
 0x237   :  { %v950_v41 = vpop.eup %949  ;;  %v470_v27 = vpop.xlane.xlu0 %469  ;;  %v579_v33 = vadd.f32 %v1344_v19, %v556_v0  ;;  %v527_v34 = vmul.f32 %v948_v20, %v1283_v7  ;;  %v631_v35 = vsel %vm55_vm0, %v599_v10, 0.0  ;;  %v570_v45 = vadd.f32 %v1344_v19, %v547_v37 }
 0x238   :  { %959 = vrsqrt.f32 %v505_v21  ;;  %v488_v36 = vmul.f32 0.03125, %v470_v27  ;;  %617 = vadd.xlane.f32.xlu1 %v616_v5  ;;  %v532_v38 = vmul.f32 %v950_v41, %v1274_v39  ;;  %632 = vadd.xlane.f32.xlu0 %v631_v35 }
 0x239   :  { %961 = vrsqrt.f32 %v502_v23  ;;  %v602_v40 = vmul.f32 %v1350_v31, %v579_v33  ;;  %v550_v12 = vmul.f32 %v1338_v14, %v527_v34  ;;  %v593_v50 = vmul.f32 %v1350_v31, %v570_v45 }
 0x23a   :  { %v952_v18 = vpop.eup %951  ;;  %v504_v17 = vadd.f32 1e-05, %v488_v36  ;;  %v555_v7 = vmul.f32 %v1338_v14, %v532_v38 }
 0x23b   :  { %v954_v47 = vpop.eup %953  ;;  %v640_v48 = vsel %vm55_vm0, %v602_v40, 0.0  ;;  %v573_v16 = vadd.f32 %v1344_v19, %v550_v12  ;;  %v529_v39 = vmul.f32 %v952_v18, %v1295_v15  ;;  %v613_v42 = vsel %vm55_vm0, %v593_v50, 0.0 }
 0x23c   :  { %963 = vrsqrt.f32 %v504_v17  ;;  %641 = vadd.xlane.f32.xlu1 %v640_v48  ;;  %v578_v24 = vadd.f32 %v1344_v19, %v555_v7  ;;  %v526_v53 = vmul.f32 %v954_v47, %v1287_v8  ;;  %614 = vadd.xlane.f32.xlu0 %v613_v42  ;;  %v1443_v17 = vstv %s1524_s6  ;;  %s989_s6 = smov [#allocation3]  }
 0x23d   :  { %v596_v25 = vmul.f32 %v1350_v31, %v573_v16  ;;  %v552_v32 = vmul.f32 %v1338_v14, %v529_v39  ;;  %s808_s21 = sshll.u32 %s989_s6, 4  ;;  %s809_s21 = int_to_ptr.vmem [resolvable:$true] %s808_s21 }
 0x23e   :  { %v956_v54 = vpop.eup %955  ;;  %v601_v44 = vmul.f32 %v1350_v31, %v578_v24  ;;  %v549_v55 = vmul.f32 %v1338_v14, %v526_v53  ;;  %s965_s22 = scalar_lea.vmem %s809_s21, 16  ;;  %s969_s23 = scalar_lea.vmem %s809_s21, 32 }
 0x23f   :  { %v958_v15 = vpop.eup %957  ;;  %v622_v56 = vsel %vm55_vm0, %v596_v25, 0.0  ;;  %v575_v59 = vadd.f32 %v1344_v19, %v552_v32  ;;  %v535_v61 = vmul.f32 %v956_v54, %v1307_v28  ;;  %p966_p0 = scmp.ne.s32.totalorder %s809_s21, %s965_s22  ;;  %p970_p1 = scmp.lt.s32.totalorder %s809_s21, %s809_s21 }
 0x240   :  { %623 = vadd.xlane.f32.xlu1 %v622_v56  ;;  %v637_v8 = vsel %vm55_vm0, %v601_v44, 0.0  ;;  %v572_v63 = vadd.f32 %v1344_v19, %v549_v55  ;;  %v528_v1 = vmul.f32 %v958_v15, %v1299_v2  ;;  %p971_p2 = scmp.lt.s32.totalorder %s969_s23, %s965_s22 }
 0x241   :  { %v598_v49 = vmul.f32 %v1350_v31, %v575_v59  ;;  %v558_v52 = vmul.f32 %v1338_v14, %v535_v61  ;;  %638 = vadd.xlane.f32.xlu0 %v637_v8 }
 0x242   :  { %v960_v3 = vpop.eup %959  ;;  %v595_v4 = vmul.f32 %v1350_v31, %v572_v63  ;;  %v551_v43 = vmul.f32 %v1338_v14, %v528_v1  ;;  %p972_p3 = por %p971_p2, %p970_p1 }
 0x243   :  { %v962_v6 = vpop.eup %961  ;;  %v628_v28 = vsel %vm55_vm0, %v598_v49, 0.0  ;;  %v581_v46 = vadd.f32 %v1344_v19, %v558_v52  ;;  %v537_v51 = vmul.f32 %v960_v3, %v1319_v30 }
 0x244   :  { %629 = vadd.xlane.f32.xlu1 %v628_v28  ;;  %v619_v2 = vsel %vm55_vm0, %v595_v4, 0.0  ;;  %v574_v9 = vadd.f32 %v1344_v19, %v551_v43  ;;  %v534_v57 = vmul.f32 %v962_v6, %v1311_v29  ;;  %p973_p4 = pnand %p972_p3, %p966_p0 }
 0x245   :  { %v604_v11 = vmul.f32 %v1350_v31, %v581_v46  ;;  %v560_v60 = vmul.f32 %v1338_v14, %v537_v51  ;;  %620 = vadd.xlane.f32.xlu0 %v619_v2 }
 0x246   :  { %v964_v22 = vpop.eup %963  ;;  %v597_v62 = vmul.f32 %v1350_v31, %v574_v9  ;;  %v557_v58 = vmul.f32 %v1338_v14, %v534_v57 }
 0x247   :  { %v646_v0 = vsel %vm55_vm0, %v604_v11, 0.0  ;;  %v583_v30 = vadd.f32 %v1344_v19, %v560_v60  ;;  %v536_v20 = vmul.f32 %v964_v22, %v1323_v13 }
 0x248   :  { %647 = vadd.xlane.f32.xlu1 %v646_v0  ;;  %v625_v21 = vsel %vm55_vm0, %v597_v62, 0.0  ;;  %v580_v29 = vadd.f32 %v1344_v19, %v557_v58 }
 0x249   :  { %v606_v23 = vmul.f32 %v1350_v31, %v583_v30  ;;  %v559_v26 = vmul.f32 %v1338_v14, %v536_v20  ;;  %626 = vadd.xlane.f32.xlu0 %v625_v21  ;;  %v689_v14 = vlaneseq }
 0x24a   :  { %v603_v41 = vmul.f32 %v1350_v31, %v580_v29 }
 0x24b   :  { %v652_v27 = vsel %vm55_vm0, %v606_v23, 0.0  ;;  %v582_v5 = vadd.f32 %v1344_v19, %v559_v26  ;;  %v1432_v35 = vand.u32 127, %v689_v14  ;;  %v1437_v18 = vshrl.u32 %v689_v14, 7 }
 0x24c   :  { %653 = vadd.xlane.f32.xlu1 %v652_v27  ;;  %v643_v10 = vsel %vm55_vm0, %v603_v41, 0.0 }
 0x24d   :  { %v605_v13 = vmul.f32 %v1350_v31, %v582_v5  ;;  %644 = vadd.xlane.f32.xlu0 %v643_v10  ;;  %v702_v19 = vadd.s32 4294967280, %v1432_v35  ;;  %v695_v31 = vadd.s32 4294967288, %v1432_v35  ;;  %v693_v45 = vsub.s32 %v1432_v35, %v1437_v18 }
 0x24e   :  { %v709_v48 = vadd.s32 4294967272, %v1432_v35  ;;  %v1454_v25 = vadd.s32 4294967224, %v1432_v35  ;;  %v716_v32 = vadd.s32 4294967264, %v1432_v35  ;;  %v744_v42 = vadd.s32 4294967232, %v1432_v35 }
 0x24f   :  { %v649_v33 = vsel %vm55_vm0, %v605_v13, 0.0  ;;  %v705_v16 = vsub.s32 %v702_v19, %v1437_v18  ;;  %v698_v24 = vsub.s32 %v695_v31, %v1437_v18  ;;  %v1459_v44 = vadd.s32 4294967208, %v1432_v35 }
 0x250   :  { %v723_v55 = vadd.s32 4294967256, %v1432_v35  ;;  %v712_v56 = vsub.s32 %v709_v48, %v1437_v18  ;;  %v758_v61 = vadd.s32 4294967216, %v1432_v35  ;;  %v737_v49 = vadd.s32 4294967240, %v1432_v35 }
 0x251   :  { %650 = vadd.xlane.f32.xlu0 %v649_v33  ;;  %v754_v52 = vsub.s32 %v1454_v25, %v1437_v18  ;;  %v719_v3 = vsub.s32 %v716_v32, %v1437_v18  ;;  %v1470_v4 = vadd.s32 4294967192, %v1432_v35  ;;  %v730_v43 = vadd.s32 4294967248, %v1432_v35 }
 0x252   :  { %v747_v28 = vsub.s32 %v744_v42, %v1437_v18  ;;  %v768_v46 = vsub.s32 %v1459_v44, %v1437_v18  ;;  %v726_v51 = vsub.s32 %v723_v55, %v1437_v18  ;;  %v761_v57 = vsub.s32 %v758_v61, %v1437_v18 }
 0x253   :  { %v740_v62 = vsub.s32 %v737_v49, %v1437_v18  ;;  %v782_v0 = vsub.s32 %v1470_v4, %v1437_v18  ;;  %v733_v20 = vsub.s32 %v730_v43, %v1437_v18  ;;  %v793_v21 = vadd.s32 4294967176, %v1432_v35 }
 0x254   :  { %v772_v41 = vadd.s32 4294967200, %v1432_v35 }
 0x2bc   :  { %v612_v34 = vpop.xlane.xlu1 %611 }
 0x2bd   :  { %v658_v53 = vadd.f32 %v1443_v17, %v612_v34 }
 0x2bf   :  { %v699_v63 = vrot.slane %v658_v53, %v698_v24 }
 0x2c1   :  { %v1430_v36 = vpop.xlane.xlu1 %635  ;;  %v609_v37 = vpop.xlane.xlu0 %608 }
 0x2c2   :  { %v657_v7 = vadd.f32 %v1443_v17, %v609_v37  ;;  %v666_v13 = vadd.f32 %v1443_v17, %v1430_v36  ;;  %v796_v37 = vsub.s32 %v793_v21, %v1437_v18 }
 0x2c4   :  { %v694_v54 = vrot.slane %v657_v7, %v693_v45  ;;  %v775_v45 = vsub.s32 %v772_v41, %v1437_v18 }
 0x2c5   :  { %v618_v38 = vpop.xlane.xlu1 %617  ;;  %v633_v40 = vpop.xlane.xlu0 %632 }
 0x2c6   :  { %v660_v1 = vadd.f32 %v1443_v17, %v618_v38  ;;  %v701_v6 = vsel %vm700_vm1, %v699_v63, %v694_v54  ;;  %v665_v27 = vadd.f32 %v1443_v17, %v633_v40  ;;  %v786_v38 = vadd.s32 4294967184, %v1432_v35 }
 0x2c8   :  { %v713_v60 = vrot.slane %v660_v1, %v712_v56  ;;  %v748_v36 = vrot.slane %v665_v27, %v747_v28  ;;  %v789_v53 = vsub.s32 %v786_v38, %v1437_v18 }
 0x2c9   :  { %v1434_v12 = vpop.xlane.xlu1 %641  ;;  %v615_v47 = vpop.xlane.xlu0 %614 }
 0x2ca   :  { %v659_v39 = vadd.f32 %v1443_v17, %v615_v47  ;;  %v668_v40 = vadd.f32 %v1443_v17, %v1434_v12 }
 0x2cc   :  { %v706_v59 = vrot.slane %v659_v39, %v705_v16  ;;  %v755_v39 = vrot.slane %v666_v13, %v754_v52  ;;  %v769_v25 = vrot.slane %v668_v40, %v768_v46 }
 0x2cd   :  { %v624_v50 = vpop.xlane.xlu1 %623 }
 0x2ce   :  { %v639_v15 = vpop.xlane.xlu0 %638  ;;  %v708_v9 = vsel %vm707_vm2, %v706_v59, %v701_v6  ;;  %v662_v22 = vadd.f32 %v1443_v17, %v624_v50 }
 0x2cf   :  { %v715_v23 = vsel %vm714_vm3, %v713_v60, %v708_v9  ;;  %v667_v34 = vadd.f32 %v1443_v17, %v639_v15 }
 0x2d0   :  { %v727_v33 = vrot.slane %v662_v22, %v726_v51 }
 0x2d1   :  { %v630_v8 = vpop.xlane.xlu1 %629  ;;  %v762_v12 = vrot.slane %v667_v34, %v761_v57 }
 0x2d2   :  { %v621_v2 = vpop.xlane.xlu0 %620  ;;  %v664_v29 = vadd.f32 %v1443_v17, %v630_v8 }
 0x2d3   :  { %v661_v11 = vadd.f32 %v1443_v17, %v621_v2 }
 0x2d4   :  { %v741_v19 = vrot.slane %v664_v29, %v740_v62 }
 0x2d5   :  { %v720_v58 = vrot.slane %v661_v11, %v719_v3  ;;  %v648_v30 = vpop.xlane.xlu1 %647 }
 0x2d6   :  { %v627_v26 = vpop.xlane.xlu0 %626  ;;  %v670_v50 = vadd.f32 %v1443_v17, %v648_v30 }
 0x2d7   :  { %v722_v5 = vsel %vm721_vm4, %v720_v58, %v715_v23  ;;  %v663_v10 = vadd.f32 %v1443_v17, %v627_v26 }
 0x2d8   :  { %v729_v31 = vsel %vm728_vm5, %v727_v33, %v722_v5  ;;  %v783_v56 = vrot.slane %v670_v50, %v782_v0 }
 0x2d9   :  { %v734_v14 = vrot.slane %v663_v10, %v733_v20  ;;  %v654_v48 = vpop.xlane.xlu1 %653 }
 0x2da   :  { %v645_v7 = vpop.xlane.xlu0 %644  ;;  %v672_v32 = vadd.f32 %v1443_v17, %v654_v48 }
 0x2db   :  { %v736_v47 = vsel %vm735_vm6, %v734_v14, %v729_v31  ;;  %v669_v16 = vadd.f32 %v1443_v17, %v645_v7 }
 0x2dc   :  { %v743_v35 = vsel %vm742_vm7, %v741_v19, %v736_v47  ;;  %v797_v18 = vrot.slane %v672_v32, %v796_v37 }
 0x2dd   :  { %v750_v24 = vsel %vm749_vm8, %v748_v36, %v743_v35  ;;  %v776_v55 = vrot.slane %v669_v16, %v775_v45 }
 0x2de   :  { %v757_v54 = vsel %vm756_vm9, %v755_v39, %v750_v24  ;;  %v651_v42 = vpop.xlane.xlu0 %650 }
 0x2df   :  { %v764_v44 = vsel %vm763_vm10, %v762_v12, %v757_v54  ;;  %v671_v15 = vadd.f32 %v1443_v17, %v651_v42 }
 0x2e0   :  { %v771_v59 = vsel %vm770_vm11, %v769_v25, %v764_v44 }
 0x2e1   :  { %v778_v61 = vsel %vm777_vm12, %v776_v55, %v771_v59  ;;  %v790_v8 = vrot.slane %v671_v15, %v789_v53 }
 0x2e2   :  { %v785_v63 = vsel %vm784_vm13, %v783_v56, %v778_v61 }
 0x2e3   :  { %v792_v1 = vsel %vm791_vm14, %v790_v8, %v785_v63 }
 0x2e4   :  { %v799_v49 = vsel %vm798_vm15, %v797_v18, %v792_v1 }
 0x2e5   :  { %801 = vst [vmem:[#allocation3] sm:$0x1] %v799_v49 }
 0x2e6   :  { %976 = shalt.err (!%p973_p4)
}
 0x2e7   :  { %s977_s26 = scalar_lea.hbm %s1525_s7, 16 }
 0x2e8   :  { %p978_p5 = scmp.ne.s32.totalorder %s1525_s7, %s977_s26  ;;  %p981_p6 = scmp.lt.u32.totalorder %s977_s26, %s1525_s7 }
 0x2ea   :  { %p983_p7 = pnand %p981_p6, %p978_p5 }
 0x2ec   :  { %986 = shalt.err (!%p983_p7)
}
 0x2ed   :  { %811 = dma.vmem_to_hbm [thread:$0]  %s809_s21, 16, %s1525_s7, [#allocation4]  }
 0x2ee   :  { %987 = dma.done.wait [#allocation4], 16  }
 0x2ef   :  { %988 = vsyncadd [#allocation4], 4294967280 }
 0x2f0   :  { %815 = vsyncpa [#allocation4], 1 }

</bundles_post_ra>
